<compile_context>
chip_gen: v7x
topology: tpu7x:2x2x1
jax: 0.10.0
libtpu: 0.0.40
codegen_flags: <defaults>
</compile_context>

<pallas_src>
import functools

import jax
import jax.numpy as jnp
from jax.experimental import pallas as pl
from jax.experimental.pallas import tpu as pltpu


# ------------------------ kernel 1: fused gated conv + BN stats -------------
def _gated_conv_kernel(xp_ref, wbd_ref, bias_ref, o_ref, stats_ref,
                       *, H, W, K, dilation, cin, cout):
    """Per-image gated conv.

    xp_ref   : (1, Hp, Wp*Cin)        lane-flattened reflect-padded input
    wbd_ref  : (K*K, W*Cin, 2*W*Cout) block-diagonal fused (feat|mask) weights
    bias_ref : (1, 2*W*Cout)          fused, W-tiled biases
    o_ref    : (1, H, W*Cout)         gated output (lane-dense store)
    stats_ref: (1, 2, W*Cout)         per-image [sum; sum of squares] over H
    """
    xp = xp_ref[0]                                       # (Hp, Wp*Cin)

    acc = jnp.zeros((H, 2 * W * cout), jnp.float32)
    # Tap loop: K*K lane-dense MXU matmuls (one per tap, both convs fused).
    for kh in range(K):
        for kw in range(K):
            r0 = kh * dilation
            c0 = kw * dilation * cin
            patch = xp[r0:r0 + H, c0:c0 + W * cin]       # (H, W*Cin) 2-D slice
            acc = acc + jnp.dot(patch, wbd_ref[kh * K + kw],
                                preferred_element_type=jnp.float32)
    acc = acc + bias_ref[...]                            # (1, 2*W*Cout) bcast

    feat_pre = acc[:, :W * cout]                         # clean 128-lane split
    mask_pre = acc[:, W * cout:]

    # ELU(alpha=1); clamp before exp so the untaken branch cannot overflow.
    feat = jnp.where(feat_pre > 0, feat_pre,
                     jnp.exp(jnp.minimum(feat_pre, 0.0)) - 1.0)
    # sigmoid via exp (EUP) + reciprocal; guaranteed lowering on all TPUs.
    mask = pl.reciprocal(1.0 + jnp.exp(-mask_pre))

    gated = feat * mask                                  # (H, W*Cout)
    o_ref[0] = gated                                     # dense, unmasked vst

    # Per-image partial BatchNorm stats (sublane reduction over H); the tiny
    # cross-image / cross-W reduction is done in the wrapper.
    s1 = jnp.sum(gated, axis=0, keepdims=True)           # (1, W*Cout)
    s2 = jnp.sum(gated * gated, axis=0, keepdims=True)   # (1, W*Cout)
    stats_ref[0] = jnp.concatenate([s1, s2], axis=0)     # (2, W*Cout)


# ------------------------ kernel 2: BatchNorm normalize-only ----------------
def _bn_apply_kernel(y_ref, scale_ref, shift_ref, o_ref):
    """out = y * scale + shift  with precomputed per-channel scale/shift."""
    o_ref[...] = y_ref[...] * scale_ref[...] + shift_ref[...]


# ------------------------ wrapper --------------------------------------------
def gated_conv_block(x_nchw, wf, bf, wm, bm, gamma, beta,
                     *, filter_size=3, stride=1, dilation=1, eps=1e-5):
    assert stride == 1, "kernel implements the default stride=1 configuration"
    N, Cin, H, W = x_nchw.shape
    K = filter_size
    Cout = wf.shape[-1]
    pad = dilation * (K - 1) // 2

    # --- glue (small XLA ops): NCHW -> lane-flattened NHWC + reflect pad -----
    x = jnp.transpose(x_nchw, (0, 2, 3, 1)).astype(jnp.float32)
    xp = jnp.pad(x, ((0, 0), (pad, pad), (pad, pad), (0, 0)), mode="reflect")
    Hp, Wp = xp.shape[1], xp.shape[2]
    xp_flat = xp.reshape(N, Hp, Wp * Cin)

    # --- fused block-diagonal weights (built once per call, tiny) ------------
    # wbd[tap][w*Cin+ci, w*Cout+co]            = wf[kh,kw,ci,co]
    # wbd[tap][w*Cin+ci, W*Cout + w*Cout+co]   = wm[kh,kw,ci,co]
    eye_w = jnp.eye(W, dtype=jnp.float32)
    wbd_f = jnp.einsum("uv,abcd->abucvd", eye_w, wf.astype(jnp.float32))
    wbd_f = wbd_f.reshape(K * K, W * Cin, W * Cout)
    wbd_m = jnp.einsum("uv,abcd->abucvd", eye_w, wm.astype(jnp.float32))
    wbd_m = wbd_m.reshape(K * K, W * Cin, W * Cout)
    wbd = jnp.concatenate([wbd_f, wbd_m], axis=-1)       # (K*K, W*Cin, 2*W*Cout)

    bias_flat = jnp.concatenate([jnp.tile(bf.astype(jnp.float32), W),
                                 jnp.tile(bm.astype(jnp.float32), W)])
    bias_flat = bias_flat.reshape(1, 2 * W * Cout)

    # --- conv + gate + per-image BN stats, grid over N ("parallel") ----------
    conv_fn = pl.pallas_call(
        functools.partial(_gated_conv_kernel, H=H, W=W, K=K,
                          dilation=dilation, cin=Cin, cout=Cout),
        out_shape=(
            jax.ShapeDtypeStruct((N, H, W * Cout), jnp.float32),
            jax.ShapeDtypeStruct((N, 2, W * Cout), jnp.float32),
        ),
        grid_spec=pltpu.PrefetchScalarGridSpec(
            num_scalar_prefetch=0,
            grid=(N,),
            in_specs=[
                pl.BlockSpec((1, Hp, Wp * Cin), lambda n: (n, 0, 0)),
                pl.BlockSpec((K * K, W * Cin, 2 * W * Cout),
                             lambda n: (0, 0, 0)),
                pl.BlockSpec((1, 2 * W * Cout), lambda n: (0, 0)),
            ],
            out_specs=(
                pl.BlockSpec((1, H, W * Cout), lambda n: (n, 0, 0)),
                pl.BlockSpec((1, 2, W * Cout), lambda n: (n, 0, 0)),
            ),
        ),
        compiler_params=pltpu.CompilerParams(
            dimension_semantics=("parallel",)),
    )
    gated_flat, stats = conv_fn(xp_flat, wbd, bias_flat)

    # --- finalize BatchNorm batch stats (tiny (N,2,W*Cout) reduction) --------
    stats = stats.reshape(N, 2, W, Cout)
    cnt = float(N * H * W)
    mean = jnp.sum(stats[:, 0], axis=(0, 1)) / cnt                  # (Cout,)
    var = jnp.sum(stats[:, 1], axis=(0, 1)) / cnt - mean * mean     # biased
    var = jnp.maximum(var, 0.0)
    scale_c = gamma.astype(jnp.float32) * jax.lax.rsqrt(var + eps)
    shift_c = beta.astype(jnp.float32) - mean * scale_c
    scale_flat = jnp.tile(scale_c, W).reshape(1, W * Cout)
    shift_flat = jnp.tile(shift_c, W).reshape(1, W * Cout)

    # --- normalize-only pass, tiled over N ("parallel"), lane-dense I/O ------
    bn_fn = pl.pallas_call(
        _bn_apply_kernel,
        out_shape=jax.ShapeDtypeStruct((N, H, W * Cout), jnp.float32),
        grid_spec=pltpu.PrefetchScalarGridSpec(
            num_scalar_prefetch=0,
            grid=(N,),
            in_specs=[
                pl.BlockSpec((1, H, W * Cout), lambda n: (n, 0, 0)),
                pl.BlockSpec((1, W * Cout), lambda n: (0, 0)),
                pl.BlockSpec((1, W * Cout), lambda n: (0, 0)),
            ],
            out_specs=pl.BlockSpec((1, H, W * Cout), lambda n: (n, 0, 0)),
        ),
        compiler_params=pltpu.CompilerParams(
            dimension_semantics=("parallel",)),
    )
    out_flat = bn_fn(gated_flat, scale_flat, shift_flat)

    # Back to PyTorch's NCHW convention.
    return jnp.transpose(out_flat.reshape(N, H, W, Cout), (0, 3, 1, 2))


# ------------------------ pure-JAX reference (for a self-check) -------------
def _reference(x_nchw, wf, bf, wm, bm, gamma, beta, K, dilation, eps):
    pad = dilation * (K - 1) // 2
    xp = jnp.pad(x_nchw, ((0, 0), (0, 0), (pad, pad), (pad, pad)),
                 mode="reflect")
    dn = jax.lax.conv_dimension_numbers(xp.shape, wf.shape,
                                        ("NCHW", "HWIO", "NCHW"))
    f = jax.lax.conv_general_dilated(
        xp, wf, (1, 1), "VALID", rhs_dilation=(dilation, dilation),
        dimension_numbers=dn, precision=jax.lax.Precision.HIGHEST)
    m = jax.lax.conv_general_dilated(
        xp, wm, (1, 1), "VALID", rhs_dilation=(dilation, dilation),
        dimension_numbers=dn, precision=jax.lax.Precision.HIGHEST)
    f = f + bf.reshape(1, -1, 1, 1)
    m = m + bm.reshape(1, -1, 1, 1)
    feat = jnp.where(f > 0, f, jnp.expm1(jnp.minimum(f, 0.0)))
    mask = jax.nn.sigmoid(m)
    y = feat * mask
    mean = jnp.mean(y, axis=(0, 2, 3), keepdims=True)
    var = jnp.mean((y - mean) ** 2, axis=(0, 2, 3), keepdims=True)
    return (gamma.reshape(1, -1, 1, 1) * (y - mean) * jax.lax.rsqrt(var + eps)
            + beta.reshape(1, -1, 1, 1))


if __name__ == "__main__":
    key = jax.random.PRNGKey(0)
    N, Cin, H, W = 2, 4, 16, 16
    Cout, K = 8, 3

    k1, k2, k3, k4, k5 = jax.random.split(key, 5)
    x = jax.random.normal(k1, (N, Cin, H, W), dtype=jnp.float32)

    # Deterministic Conv2d-style init (uniform in +/- 1/sqrt(fan_in)).
    fan_in = Cin * K * K
    bound = 1.0 / float(fan_in) ** 0.5
    # Weights stored as (KH, KW, Cin, Cout) (HWIO) for the NHWC kernels.
    wf = jax.random.uniform(k2, (K, K, Cin, Cout), jnp.float32, -bound, bound)
    bf = jax.random.uniform(k3, (Cout,), jnp.float32, -bound, bound)
    wm = jax.random.uniform(k4, (K, K, Cin, Cout), jnp.float32, -bound, bound)
    bm = jax.random.uniform(k5, (Cout,), jnp.float32, -bound, bound)
    # BatchNorm affine params (PyTorch default init: weight=1, bias=0).
    gamma = jnp.ones((Cout,), jnp.float32)
    beta = jnp.zeros((Cout,), jnp.float32)

    out = gated_conv_block(x, wf, bf, wm, bm, gamma, beta,
                           filter_size=K, stride=1, dilation=1)
    out = jax.block_until_ready(out)
    assert out.shape == (N, Cout, H, W)

    ref = jax.block_until_ready(
        _reference(x, wf, bf, wm, bm, gamma, beta, K, 1, 1e-5))
    assert jnp.allclose(out, ref, atol=1e-4, rtol=1e-3), (
        float(jnp.max(jnp.abs(out - ref))))

    print("KERNEL_OK")
</pallas_src>

<mosaic_0001>
module attributes {stable_mosaic.version = 11 : i64} {
  func.func @_gated_conv_kernel(%arg0: i32, %arg1: memref<1x18x72xf32, #tpu.memory_space<vmem>>, %arg2: memref<9x64x256xf32, #tpu.memory_space<vmem>>, %arg3: memref<1x256xf32, #tpu.memory_space<vmem>>, %arg4: memref<1x16x128xf32, #tpu.memory_space<vmem>>, %arg5: memref<1x2x128xf32, #tpu.memory_space<vmem>>) attributes {dimension_semantics = [#tpu.dimension_semantics<parallel>], iteration_bounds = array<i64: 2>, scalar_prefetch = 0 : i64, scratch_operands = 0 : i64, tpu.core_type = #tpu.core_type<tc>, window_params = [{transform_indices = @transform_0, window_bounds = array<i64: 1, 18, 72>}, {pipeline_mode = #tpu.pipeline_mode<synchronous>, transform_indices = @transform_1, window_bounds = array<i64: 9, 64, 256>}, {pipeline_mode = #tpu.pipeline_mode<synchronous>, transform_indices = @transform_2, window_bounds = array<i64: 1, 256>}, {transform_indices = @transform_3, window_bounds = array<i64: 1, 16, 128>}, {transform_indices = @transform_4, window_bounds = array<i64: 1, 2, 128>}]} {
    %c0 = arith.constant 0 : index
    %c0_0 = arith.constant 0 : index
    %c0_1 = arith.constant 0 : index
    %0 = vector.load %arg1[%c0, %c0_0, %c0_1] : memref<1x18x72xf32, #tpu.memory_space<vmem>>, vector<1x18x72xf32>
    %1 = vector.shape_cast %0 : vector<1x18x72xf32> to vector<18x72xf32>
    %cst = arith.constant 0.000000e+00 : f32
    %2 = vector.broadcast %cst : f32 to vector<16x256xf32>
    %3 = vector.extract_strided_slice %1 {offsets = [0, 0], sizes = [16, 64], strides = [1, 1]} : vector<18x72xf32> to vector<16x64xf32>
    %c0_2 = arith.constant 0 : index
    %c0_3 = arith.constant 0 : index
    %c0_4 = arith.constant 0 : index
    %4 = vector.load %arg2[%c0_2, %c0_3, %c0_4] : memref<9x64x256xf32, #tpu.memory_space<vmem>>, vector<1x64x256xf32>
    %5 = vector.shape_cast %4 : vector<1x64x256xf32> to vector<64x256xf32>
    %cst_5 = arith.constant dense<0.000000e+00> : vector<16x256xf32>
    %6 = tpu.matmul %3, %5, %cst_5 {dimension_numbers = #tpu.dot_dimension_numbers<[1], [0], [0], [1], [0, 0, 1, 1], [], []>} : vector<16x64xf32>, vector<64x256xf32>, vector<16x256xf32> -> vector<16x256xf32>
    %7 = arith.addf %2, %6 : vector<16x256xf32>
    %8 = vector.extract_strided_slice %1 {offsets = [0, 4], sizes = [16, 64], strides = [1, 1]} : vector<18x72xf32> to vector<16x64xf32>
    %c1 = arith.constant 1 : index
    %c0_6 = arith.constant 0 : index
    %c0_7 = arith.constant 0 : index
    %9 = vector.load %arg2[%c1, %c0_6, %c0_7] : memref<9x64x256xf32, #tpu.memory_space<vmem>>, vector<1x64x256xf32>
    %10 = vector.shape_cast %9 : vector<1x64x256xf32> to vector<64x256xf32>
    %cst_8 = arith.constant dense<0.000000e+00> : vector<16x256xf32>
    %11 = tpu.matmul %8, %10, %cst_8 {dimension_numbers = #tpu.dot_dimension_numbers<[1], [0], [0], [1], [0, 0, 1, 1], [], []>} : vector<16x64xf32>, vector<64x256xf32>, vector<16x256xf32> -> vector<16x256xf32>
    %12 = arith.addf %7, %11 : vector<16x256xf32>
    %13 = vector.extract_strided_slice %1 {offsets = [0, 8], sizes = [16, 64], strides = [1, 1]} : vector<18x72xf32> to vector<16x64xf32>
    %c2 = arith.constant 2 : index
    %c0_9 = arith.constant 0 : index
    %c0_10 = arith.constant 0 : index
    %14 = vector.load %arg2[%c2, %c0_9, %c0_10] : memref<9x64x256xf32, #tpu.memory_space<vmem>>, vector<1x64x256xf32>
    %15 = vector.shape_cast %14 : vector<1x64x256xf32> to vector<64x256xf32>
    %cst_11 = arith.constant dense<0.000000e+00> : vector<16x256xf32>
    %16 = tpu.matmul %13, %15, %cst_11 {dimension_numbers = #tpu.dot_dimension_numbers<[1], [0], [0], [1], [0, 0, 1, 1], [], []>} : vector<16x64xf32>, vector<64x256xf32>, vector<16x256xf32> -> vector<16x256xf32>
    %17 = arith.addf %12, %16 : vector<16x256xf32>
    %18 = vector.extract_strided_slice %1 {offsets = [1, 0], sizes = [16, 64], strides = [1, 1]} : vector<18x72xf32> to vector<16x64xf32>
    %c3 = arith.constant 3 : index
    %c0_12 = arith.constant 0 : index
    %c0_13 = arith.constant 0 : index
    %19 = vector.load %arg2[%c3, %c0_12, %c0_13] : memref<9x64x256xf32, #tpu.memory_space<vmem>>, vector<1x64x256xf32>
    %20 = vector.shape_cast %19 : vector<1x64x256xf32> to vector<64x256xf32>
    %cst_14 = arith.constant dense<0.000000e+00> : vector<16x256xf32>
    %21 = tpu.matmul %18, %20, %cst_14 {dimension_numbers = #tpu.dot_dimension_numbers<[1], [0], [0], [1], [0, 0, 1, 1], [], []>} : vector<16x64xf32>, vector<64x256xf32>, vector<16x256xf32> -> vector<16x256xf32>
    %22 = arith.addf %17, %21 : vector<16x256xf32>
    %23 = vector.extract_strided_slice %1 {offsets = [1, 4], sizes = [16, 64], strides = [1, 1]} : vector<18x72xf32> to vector<16x64xf32>
    %c4 = arith.constant 4 : index
    %c0_15 = arith.constant 0 : index
    %c0_16 = arith.constant 0 : index
    %24 = vector.load %arg2[%c4, %c0_15, %c0_16] : memref<9x64x256xf32, #tpu.memory_space<vmem>>, vector<1x64x256xf32>
    %25 = vector.shape_cast %24 : vector<1x64x256xf32> to vector<64x256xf32>
    %cst_17 = arith.constant dense<0.000000e+00> : vector<16x256xf32>
    %26 = tpu.matmul %23, %25, %cst_17 {dimension_numbers = #tpu.dot_dimension_numbers<[1], [0], [0], [1], [0, 0, 1, 1], [], []>} : vector<16x64xf32>, vector<64x256xf32>, vector<16x256xf32> -> vector<16x256xf32>
    %27 = arith.addf %22, %26 : vector<16x256xf32>
    %28 = vector.extract_strided_slice %1 {offsets = [1, 8], sizes = [16, 64], strides = [1, 1]} : vector<18x72xf32> to vector<16x64xf32>
    %c5 = arith.constant 5 : index
    %c0_18 = arith.constant 0 : index
    %c0_19 = arith.constant 0 : index
    %29 = vector.load %arg2[%c5, %c0_18, %c0_19] : memref<9x64x256xf32, #tpu.memory_space<vmem>>, vector<1x64x256xf32>
    %30 = vector.shape_cast %29 : vector<1x64x256xf32> to vector<64x256xf32>
    %cst_20 = arith.constant dense<0.000000e+00> : vector<16x256xf32>
    %31 = tpu.matmul %28, %30, %cst_20 {dimension_numbers = #tpu.dot_dimension_numbers<[1], [0], [0], [1], [0, 0, 1, 1], [], []>} : vector<16x64xf32>, vector<64x256xf32>, vector<16x256xf32> -> vector<16x256xf32>
    %32 = arith.addf %27, %31 : vector<16x256xf32>
    %33 = vector.extract_strided_slice %1 {offsets = [2, 0], sizes = [16, 64], strides = [1, 1]} : vector<18x72xf32> to vector<16x64xf32>
    %c6 = arith.constant 6 : index
    %c0_21 = arith.constant 0 : index
    %c0_22 = arith.constant 0 : index
    %34 = vector.load %arg2[%c6, %c0_21, %c0_22] : memref<9x64x256xf32, #tpu.memory_space<vmem>>, vector<1x64x256xf32>
    %35 = vector.shape_cast %34 : vector<1x64x256xf32> to vector<64x256xf32>
    %cst_23 = arith.constant dense<0.000000e+00> : vector<16x256xf32>
    %36 = tpu.matmul %33, %35, %cst_23 {dimension_numbers = #tpu.dot_dimension_numbers<[1], [0], [0], [1], [0, 0, 1, 1], [], []>} : vector<16x64xf32>, vector<64x256xf32>, vector<16x256xf32> -> vector<16x256xf32>
    %37 = arith.addf %32, %36 : vector<16x256xf32>
    %38 = vector.extract_strided_slice %1 {offsets = [2, 4], sizes = [16, 64], strides = [1, 1]} : vector<18x72xf32> to vector<16x64xf32>
    %c7 = arith.constant 7 : index
    %c0_24 = arith.constant 0 : index
    %c0_25 = arith.constant 0 : index
    %39 = vector.load %arg2[%c7, %c0_24, %c0_25] : memref<9x64x256xf32, #tpu.memory_space<vmem>>, vector<1x64x256xf32>
    %40 = vector.shape_cast %39 : vector<1x64x256xf32> to vector<64x256xf32>
    %cst_26 = arith.constant dense<0.000000e+00> : vector<16x256xf32>
    %41 = tpu.matmul %38, %40, %cst_26 {dimension_numbers = #tpu.dot_dimension_numbers<[1], [0], [0], [1], [0, 0, 1, 1], [], []>} : vector<16x64xf32>, vector<64x256xf32>, vector<16x256xf32> -> vector<16x256xf32>
    %42 = arith.addf %37, %41 : vector<16x256xf32>
    %43 = vector.extract_strided_slice %1 {offsets = [2, 8], sizes = [16, 64], strides = [1, 1]} : vector<18x72xf32> to vector<16x64xf32>
    %c8 = arith.constant 8 : index
    %c0_27 = arith.constant 0 : index
    %c0_28 = arith.constant 0 : index
    %44 = vector.load %arg2[%c8, %c0_27, %c0_28] : memref<9x64x256xf32, #tpu.memory_space<vmem>>, vector<1x64x256xf32>
    %45 = vector.shape_cast %44 : vector<1x64x256xf32> to vector<64x256xf32>
    %cst_29 = arith.constant dense<0.000000e+00> : vector<16x256xf32>
    %46 = tpu.matmul %43, %45, %cst_29 {dimension_numbers = #tpu.dot_dimension_numbers<[1], [0], [0], [1], [0, 0, 1, 1], [], []>} : vector<16x64xf32>, vector<64x256xf32>, vector<16x256xf32> -> vector<16x256xf32>
    %47 = arith.addf %42, %46 : vector<16x256xf32>
    %c0_30 = arith.constant 0 : index
    %c0_31 = arith.constant 0 : index
    %48 = vector.load %arg3[%c0_30, %c0_31] : memref<1x256xf32, #tpu.memory_space<vmem>>, vector<1x256xf32>
    %49 = vector.broadcast %48 : vector<1x256xf32> to vector<16x256xf32>
    %50 = arith.addf %47, %49 : vector<16x256xf32>
    %51 = vector.extract_strided_slice %50 {offsets = [0, 0], sizes = [16, 128], strides = [1, 1]} : vector<16x256xf32> to vector<16x128xf32>
    %52 = vector.extract_strided_slice %50 {offsets = [0, 128], sizes = [16, 128], strides = [1, 1]} : vector<16x256xf32> to vector<16x128xf32>
    %cst_32 = arith.constant 0.000000e+00 : f32
    %53 = vector.broadcast %cst_32 : f32 to vector<16x128xf32>
    %54 = arith.cmpf ogt, %51, %53 : vector<16x128xf32>
    %cst_33 = arith.constant 0.000000e+00 : f32
    %55 = vector.broadcast %cst_33 : f32 to vector<16x128xf32>
    %56 = arith.minimumf %51, %55 : vector<16x128xf32>
    %57 = math.exp %56 : vector<16x128xf32>
    %cst_34 = arith.constant 1.000000e+00 : f32
    %58 = vector.broadcast %cst_34 : f32 to vector<16x128xf32>
    %59 = arith.subf %57, %58 : vector<16x128xf32>
    %60 = arith.select %54, %51, %59 : vector<16x128xi1>, vector<16x128xf32>
    %cst_35 = arith.constant 0.000000e+00 : f32
    %61 = vector.broadcast %cst_35 : f32 to vector<16x128xf32>
    %62 = arith.subf %61, %52 : vector<16x128xf32>
    %63 = math.exp %62 : vector<16x128xf32>
    %cst_36 = arith.constant 1.000000e+00 : f32
    %64 = vector.broadcast %cst_36 : f32 to vector<16x128xf32>
    %65 = arith.addf %64, %63 : vector<16x128xf32>
    %66 = tpu.reciprocal %65 : vector<16x128xf32> -> vector<16x128xf32>
    %67 = arith.mulf %60, %66 : vector<16x128xf32>
    %c0_37 = arith.constant 0 : index
    %c0_38 = arith.constant 0 : index
    %c0_39 = arith.constant 0 : index
    %68 = vector.load %arg4[%c0_37, %c0_38, %c0_39] : memref<1x16x128xf32, #tpu.memory_space<vmem>>, vector<1x16x128xf32>
    %69 = vector.shape_cast %68 : vector<1x16x128xf32> to vector<16x128xf32>
    %70 = vector.shape_cast %67 : vector<16x128xf32> to vector<1x16x128xf32>
    tpu.vector_store %arg4[%c0_37, %c0_38, %c0_39], %70 {strides = array<i32>} : memref<1x16x128xf32, #tpu.memory_space<vmem>>, vector<1x16x128xf32>,
    %cst_40 = arith.constant dense<0.000000e+00> : vector<128xf32>
    %71 = vector.multi_reduction <add>, %67, %cst_40 [0] : vector<16x128xf32> to vector<128xf32>
    %72 = vector.shape_cast %71 : vector<128xf32> to vector<1x128xf32>
    %73 = arith.mulf %67, %67 : vector<16x128xf32>
    %cst_41 = arith.constant dense<0.000000e+00> : vector<128xf32>
    %74 = vector.multi_reduction <add>, %73, %cst_41 [0] : vector<16x128xf32> to vector<128xf32>
    %75 = vector.shape_cast %74 : vector<128xf32> to vector<1x128xf32>
    %76 = tpu.concatenate %72, %75 in 0 : vector<1x128xf32>, vector<1x128xf32> -> vector<2x128xf32>
    %c0_42 = arith.constant 0 : index
    %c0_43 = arith.constant 0 : index
    %c0_44 = arith.constant 0 : index
    %77 = vector.load %arg5[%c0_42, %c0_43, %c0_44] : memref<1x2x128xf32, #tpu.memory_space<vmem>>, vector<1x2x128xf32>
    %78 = vector.shape_cast %77 : vector<1x2x128xf32> to vector<2x128xf32>
    %79 = vector.shape_cast %76 : vector<2x128xf32> to vector<1x2x128xf32>
    tpu.vector_store %arg5[%c0_42, %c0_43, %c0_44], %79 {strides = array<i32>} : memref<1x2x128xf32, #tpu.memory_space<vmem>>, vector<1x2x128xf32>,
    return
  }
  func.func @transform_0(%arg0: i32) -> (i32, i32, i32) {
    %c0_i32 = arith.constant 0 : i32
    %c0_i32_0 = arith.constant 0 : i32
    %c0_i32_1 = arith.constant 0 : i32
    return %arg0, %c0_i32, %c0_i32_0 : i32, i32, i32
  }
  func.func @transform_1(%arg0: i32) -> (i32, i32, i32) {
    %c0_i32 = arith.constant 0 : i32
    %c0_i32_0 = arith.constant 0 : i32
    %c0_i32_1 = arith.constant 0 : i32
    %c0_i32_2 = arith.constant 0 : i32
    return %c0_i32, %c0_i32_0, %c0_i32_1 : i32, i32, i32
  }
  func.func @transform_2(%arg0: i32) -> (i32, i32) {
    %c0_i32 = arith.constant 0 : i32
    %c0_i32_0 = arith.constant 0 : i32
    %c0_i32_1 = arith.constant 0 : i32
    return %c0_i32, %c0_i32_0 : i32, i32
  }
  func.func @transform_3(%arg0: i32) -> (i32, i32, i32) {
    %c0_i32 = arith.constant 0 : i32
    %c0_i32_0 = arith.constant 0 : i32
    %c0_i32_1 = arith.constant 0 : i32
    return %arg0, %c0_i32, %c0_i32_0 : i32, i32, i32
  }
  func.func @transform_4(%arg0: i32) -> (i32, i32, i32) {
    %c0_i32 = arith.constant 0 : i32
    %c0_i32_0 = arith.constant 0 : i32
    %c0_i32_1 = arith.constant 0 : i32
    return %arg0, %c0_i32, %c0_i32_0 : i32, i32, i32
  }
}

</mosaic_0001>

<bundles_post_ra>
// kernel: tpu_custom_call.1
= control target key start
LH: loop header
LB: loop body
LE: loop exit
PB: predicated region body
PF: predicated region fallthrough
CT: control target
= control target key end

     0   :  { %10 = vsyncpa [#allocation3], 0  ;;  %s2095_s0 = inlined_call_operand.vmem [shape: f32[2,18,72], index: 0, kind: input, shape index: {}]   ;;  %s2096_s1 = inlined_call_operand.hbm [shape: f32[9,64,256], index: 1, kind: input, shape index: {}]   ;;  %s2097_s2 = inlined_call_operand.vmem [shape: f32[1,256], index: 2, kind: input, shape index: {}]   ;;  %s2098_s3 = inlined_call_operand.hbm [shape: f32[2,16,128], index: 3, kind: output, shape index: {0}]   ;;  %s2099_s4 = inlined_call_operand.hbm [shape: f32[2,2,128], index: 4, kind: output, shape index: {1}]  }
   0x1   :  { %11 = vsyncpa [#allocation4], 0 }
   0x2   :  { %13 = vsyncpa [#allocation4 + $0x1], 0 }
   0x3   :  { %14 = vsyncpa [#allocation7], 0 }
   0x4   :  { %16 = vsyncpa [#allocation7 + $0x1], 0  ;;  %s1832_s15 = smov 0   ;;  %s1834_s16 = smov 0  }
   0x5   :  { %s1836_s17 = smov 0   ;;  %s1838_s18 = smov 0  }
   0x6 LB: > { %s1853_s19 = sadd.s32 4294967295, %s1795_s18   ;;  %s1373_s20 = sadd.s32 4294967294, %s1795_s18   ;;  %s1795_s18 = sphi %s1838_s18, %s2115_s18   ;;  %s1791_s17 = sphi %s1836_s17, %s2114_s17   ;;  %s1787_s16 = sphi %s1834_s16, %s2113_s16   ;;  %s1783_s15 = sphi %s1832_s15, %s2112_s15  }
   0x7   : > { %s1857_s21 = sadd.s32 1, %s1795_s18   ;;  %s97_s22 = sadd.s32 1, %s1791_s17 }
   0x8   : > { %s94_s23 = ssub.s32 %s1795_s18, %s1857_s21  ;;  %p107_p0 = scmp.ne.s32.totalorder %s1791_s17, %s1787_s16 }
   0x9   : > { %p95_p1 = scmp.eq.s32.totalorder %s94_s23, 0  ;;  %p108_p2 = scmp.eq.s32.totalorder %s1853_s19, 1 }
   0xa   : > { %p113_p3 = scmp.ne.s32.totalorder %s1787_s16, %s1783_s15  ;;  %p114_p4 = scmp.eq.s32.totalorder %s1373_s20, 1 }
   0xb   : > { %s1868_s24 = scalar_select %p95_p1, %s1791_s17, %s97_s22  }
   0xc   : > { %p1870_p5 = por %p108_p2, %p107_p0  ;;  %p1874_p6 = por %p114_p4, %p113_p3 }
   0xd   : > { %p1374_p7 = scmp.ge.s32.totalorder %s1795_s18, 1  ;;  %p147_p8 = scmp.lt.s32.totalorder %s1795_s18, 3 }
   0xe   : > { %s2103_s25 = scalar_select %p1870_p5, 1, 0 }
   0xf   : > { %s2104_s26 = scalar_select %p1874_p6, 1, 0 }
  0x10   : > { %p2100_p9 = scmp.eq.s32.totalorder %s1853_s19, 0  ;;  %p1881_p10 = pnand %p1374_p7, %p147_p8 }
  0x11   : > { %s1797_s28 = smov [#allocation2]   ;;  %s1669_s7 = scalar_lea.hbm %s2096_s1, 18432 }
  0x12   : > { %s2105_s27 = scalar_select %p1881_p10, 1, 0 }
  0x13   : > { %s159_s29 = sshll.u32 %s1797_s28, 4  ;;  %p1603_p11 = pneg %p1881_p10  ;;  %s160_s29 = int_to_ptr.vmem [resolvable:$true] %s159_s29 }
  0x14   : > { %p1670_p13 = scmp.ne.s32.totalorder %s2096_s1, %s1669_s7  ;;  %p1676_p3 = scmp.lt.u32.totalorder %s1669_s7, %s2096_s1 }
  0x15   : > { %p1889_p12 = pnand %p2100_p9, %p1603_p11 }
  0x17   : > { %p1671_p0 = pneg %p1889_p12 }
  0x19   : > { %p1672_p1 = pnand %p1671_p0, %p1670_p13 }
  0x1b   : > { %p1673_p2 = pneg %p1672_p1 }
  0x1d   : > { %p1678_p4 = pnand %p1676_p3, %p1673_p2 }
  0x1f   : > { %1681 = shalt.err (!%p1678_p4)
}
  0x20   : > { %s1682_s12 = scalar_lea.vmem %s160_s29, 18432  ;;  %p1690_p9 = scmp.lt.s32.totalorder %s160_s29, %s160_s29 }
  0x21   : > { %p1683_p7 = scmp.ne.s32.totalorder %s160_s29, %s1682_s12  ;;  %p1691_p6 = scmp.lt.s32.totalorder %s1682_s12, %s1682_s12 }
  0x23   : > { %p1685_p8 = pnand %p1683_p7, %p1671_p0  ;;  %p1692_p5 = por %p1691_p6, %p1690_p9 }
  0x25   : > { %p1686_p11 = pneg %p1685_p8 }
  0x27   : > { %p1693_p10 = pnand %p1692_p5, %p1686_p11 }
  0x29   : > { %1696 = shalt.err (!%p1693_p10)
}
  0x2a   : > { %s1798_s13 = smov 256   ;;  %s1799_s14 = smov 16  }
  0x2b   : > { %1606 = dma.hbm_to_vmem [thread:$0]  (!%p1889_p12), %s2096_s1, 18432, %s160_s29, [#allocation3], %s1798_s13, %s1798_s13, %s1799_s14  }
  0x2c   : > { %p2107_p13 = scmp.ne.s32.totalorder %s2105_s27, 0 }
  0x2d   : > { %p2108_p1 = scmp.eq.s32.totalorder (!%p2107_p13), %s1853_s19, 0 }
  0x2e   : > { %186 = sbr.rel (%p2107_p13) target bundleno = 534 (0x216), region = 32 }
  0x35   : > { %1770 = dma.done.wait (%p2108_p1), [#allocation3], 18432   ;;  %p2109_p0 = pmov %p2108_p1 }
  0x36   : > { %p217_p5 = scmp.lt.s32.totalorder %s1853_s19, 1  ;;  %v1800_v0 = vmov 0.0   ;;  %vm551_vm0 = vcmask 1046528   ;;  %s1801_s5 = smov 124   ;;  %v243_v7 = vld [vmem:[#allocation2 + $0x88] sm:$0xff]  ;;  %v245_v8 = vld [vmem:[#allocation2 + $0x98] sm:$0xff] }
  0x37   : > { %1772 = vsyncadd (%p2109_p0), [#allocation3], 4294948864  ;;  %333 = vmatprep.mubr.f32.mxu1 %v1800_v0  ;;  %731 = vmatprep.mubr.f32.mxu0 %v1800_v0  ;;  %v1410_v9 = vpack.c.bf16 %v245_v8, %v243_v7  ;;  %v242_v10 = vld [vmem:[#allocation2 + $0x80] sm:$0xff]  ;;  %v244_v11 = vld [vmem:[#allocation2 + $0x90] sm:$0xff]  ;;  %s1802_s6 = smov 120   ;;  %vm871_vm1 = vcmask 1045504  }
  0x38   : > { %s218_s23 = scalar_select %p217_p5, %s1853_s19, 1  ;;  %v247_v12 = vld [vmem:[#allocation2 + $0xa8] sm:$0xff]  ;;  %v1412_v15 = vpack.c.bf16 %v244_v11, %v242_v10  ;;  %v249_v16 = vld [vmem:[#allocation2 + $0xb8] sm:$0xff]  ;;  %v246_v21 = vld [vmem:[#allocation2 + $0xa0] sm:$0xff]  ;;  %vm264_vm2 = vcmask 523264  }
  0x39   : > { %v644_v17 = vld [vmem:[#allocation2 + $0x208] sm:$0xff]  ;;  %v646_v18 = vld [vmem:[#allocation2 + $0x218] sm:$0xff]  ;;  %1411 = vmatprep.subr.bf16.mxu1 %v1410_v9  ;;  %v1414_v19 = vpack.c.bf16 %v249_v16, %v247_v12  ;;  %v248_v22 = vld [vmem:[#allocation2 + $0xb0] sm:$0xff]  ;;  %s2012_s9 = sand.u32 1, %s1787_s16   ;;  %s1409_s11 = sshll.u32 %s1853_s19, 8 }
  0x3a   : > { %s1594_s28 = smul.u32 24, %s218_s23  ;;  %v1474_v20 = vpack.c.bf16 %v646_v18, %v644_v17  ;;  %v643_v23 = vld [vmem:[#allocation2 + $0x200] sm:$0xff]  ;;  %v645_v24 = vld [vmem:[#allocation2 + $0x210] sm:$0xff]  ;;  %v251_v25 = vld [vmem:[#allocation2 + $0xc8] sm:$0xff]  ;;  %1413 = vmatpush1.bf16.msra.mxu1 %v1412_v15  ;;  %v1416_v27 = vpack.c.bf16 %v248_v22, %v246_v21  ;;  %s1379_s10 = sshll.u32 %s2012_s9, 4 }
  0x3b   : > { %v253_v26 = vld [vmem:[#allocation2 + $0xd8] sm:$0xff]  ;;  %v1476_v28 = vpack.c.bf16 %v645_v24, %v643_v23  ;;  %v648_v29 = vld [vmem:[#allocation2 + $0x228] sm:$0xff]  ;;  %v250_v31 = vld [vmem:[#allocation2 + $0xc0] sm:$0xff]  ;;  %1415 = vmatprep.subr.bf16.mxu1 %v1414_v19  ;;  %s209_s12 = scalar_lea.vmem [#allocation5], %s1379_s10  ;;  %s2019_s22 = scalar_lea.hbm %s2098_s3, %s1409_s11 }
  0x3c   : > { %s221_s27 = scalar_lea.vmem %s2095_s0, %s1594_s28  ;;  %1475 = vmatprep.subr.bf16.mxu0 %v1474_v20  ;;  %v650_v30 = vld [vmem:[#allocation2 + $0x238] sm:$0xff]  ;;  %v1418_v32 = vpack.c.bf16 %v253_v26, %v251_v25  ;;  %v252_v34 = vld [vmem:[#allocation2 + $0xd0] sm:$0xff]  ;;  %v647_v35 = vld [vmem:[#allocation2 + $0x220] sm:$0xff]  ;;  %s1254_s13 = sshll.u32 %s209_s12, 4  ;;  %s2021_s13 = int_to_ptr.vmem [resolvable:$true] %s1254_s13 }
  0x3d   : > { %v1922_v1 = vld [vmem:[%s221_s27] sm:$0xff]  ;;  %v1924_v2 = vld [vmem:[%s221_s27 + $0x8] sm:$0xff]  ;;  %v1926_v3 = vld [vmem:[%s221_s27 + $0x10] sm:$0x3]  ;;  %v1478_v33 = vpack.c.bf16 %v650_v30, %v648_v29  ;;  %1477 = vmatpush1.bf16.msra.mxu0 %v1476_v28  ;;  %v1420_v45 = vpack.c.bf16 %v252_v34, %v250_v31  ;;  %s1236_s23 = scalar_lea.sflag [#allocation4], %s2012_s9  ;;  %s1697_s28 = scalar_lea.vmem %s2021_s13, 256 }
  0x3e   : > { %260 = vrot.lane.b32.xlu0 %v1922_v1, %s1801_s5  ;;  %v552_v4 = vrot.slane %v1922_v1, 1  ;;  %v553_v5 = vrot.slane %v1924_v2, 1  ;;  %262 = vrot.lane.b32.xlu1 %v1924_v2, %s1801_s5  ;;  %v555_v6 = vrot.slane %v1926_v3, 1  ;;  %v649_v36 = vld [vmem:[#allocation2 + $0x230] sm:$0xff]  ;;  %v255_v38 = vld [vmem:[#allocation2 + $0xe8] sm:$0xff]  ;;  %v257_v39 = vld [vmem:[#allocation2 + $0xf8] sm:$0xff]  ;;  %p1698_p6 = scmp.ne.s32.totalorder %s2021_s13, %s1697_s28 }
  0x3f   : > { %v1480_v37 = vpack.c.bf16 %v649_v36, %v647_v35  ;;  %v652_v40 = vld [vmem:[#allocation2 + $0x248] sm:$0xff]  ;;  %v872_v41 = vrot.slane %v1922_v1, 2  ;;  %v873_v42 = vrot.slane %v1924_v2, 2  ;;  %v654_v43 = vld [vmem:[#allocation2 + $0x258] sm:$0xff]  ;;  %v875_v44 = vrot.slane %v1926_v3, 2  ;;  %1417 = vmatpush1.bf16.msra.mxu1 %v1416_v27  ;;  %1479 = vmatprep.subr.bf16.mxu0 %v1478_v33  ;;  %v254_v47 = vld [vmem:[#allocation2 + $0xe0] sm:$0xff] }
  0x40   : > { %v1935_v13 = vsel %vm551_vm0, %v552_v4, %v553_v5  ;;  %v1937_v14 = vsel %vm551_vm0, %v553_v5, %v555_v6  ;;  %v1482_v46 = vpack.c.bf16 %v654_v43, %v652_v40  ;;  %v651_v48 = vld [vmem:[#allocation2 + $0x240] sm:$0xff]  ;;  %v653_v49 = vld [vmem:[#allocation2 + $0x250] sm:$0xff]  ;;  %1419 = vmatprep.subr.bf16.mxu1 %v1418_v32  ;;  %v1422_v50 = vpack.c.bf16 %v257_v39, %v255_v38  ;;  %v656_v52 = vld [vmem:[#allocation2 + $0x268] sm:$0xff]  ;;  %p2110_p9 = scmp.ne.s32.totalorder %s2103_s25, 0  ;;  %s1803_s29 = smov [#allocation5]  }
  0x41   : > { %v256_v51 = vld [vmem:[#allocation2 + $0xf0] sm:$0xff]  ;;  %v658_v53 = vld [vmem:[#allocation2 + $0x278] sm:$0xff]  ;;  %1481 = vmatpush1.bf16.msra.mxu0 %v1480_v37  ;;  %v1484_v54 = vpack.c.bf16 %v653_v49, %v651_v48  ;;  %v226_v55 = vld [vmem:[#allocation2 + $0x8] sm:$0xff]  ;;  %v1955_v57 = vsel %vm871_vm1, %v872_v41, %v873_v42  ;;  %v1958_v60 = vsel %vm871_vm1, %v873_v42, %v875_v44  ;;  %s1701_s30 = sshll.u32 %s1803_s29, 4  ;;  %s1702_s30 = int_to_ptr.vmem [resolvable:$false] %s1701_s30 }
  0x42   : > { %659 = vrot.lane.b32.xlu0 %v1935_v13, %s1801_s5  ;;  %661 = vrot.lane.b32.xlu1 %v1937_v14, %s1801_s5  ;;  %v228_v56 = vld [vmem:[#allocation2 + $0x18] sm:$0xff]  ;;  %v655_v58 = vld [vmem:[#allocation2 + $0x260] sm:$0xff]  ;;  %v657_v59 = vld [vmem:[#allocation2 + $0x270] sm:$0xff]  ;;  %v1424_v61 = vpack.c.bf16 %v256_v51, %v254_v47  ;;  %v1486_v62 = vpack.c.bf16 %v658_v53, %v656_v52  ;;  %p1699_p10 = pnand %p1698_p6, %p2110_p9  ;;  %s1703_s27 = scalar_lea.vmem %s1702_s30, 512 }
  0x43   : > { %1421 = vmatpush1.bf16.msra.mxu1 %v1420_v45  ;;  %1483 = vmatprep.subr.bf16.mxu0 %v1482_v46  ;;  %v1426_v63 = vpack.c.bf16 %v228_v56, %v226_v55  ;;  %v750_v3 = vld [vmem:[#allocation2 + $0x288] sm:$0xff]  ;;  %v752_v4 = vld [vmem:[#allocation2 + $0x298] sm:$0xff]  ;;  %v1488_v5 = vpack.c.bf16 %v657_v59, %v655_v58  ;;  %v225_v7 = vld [vmem:[#allocation2] sm:$0xff]  ;;  %p1704_p2 = scmp.lt.s32.totalorder %s2021_s13, %s1702_s30  ;;  %p1705_p3 = scmp.lt.s32.totalorder %s1703_s27, %s1697_s28 }
  0x44   : > { %1423 = vmatprep.subr.bf16.mxu1 %v1422_v50  ;;  %v1490_v6 = vpack.c.bf16 %v752_v4, %v750_v3  ;;  %v227_v8 = vld [vmem:[#allocation2 + $0x10] sm:$0xff]  ;;  %v230_v9 = vld [vmem:[#allocation2 + $0x28] sm:$0xff]  ;;  %v232_v10 = vld [vmem:[#allocation2 + $0x38] sm:$0xff]  ;;  %p1700_p12 = pneg %p1699_p10 }
  0x45   : > { %1485 = vmatpush1.bf16.msra.mxu0 %v1484_v54  ;;  %v1428_v11 = vpack.c.bf16 %v227_v8, %v225_v7  ;;  %v229_v12 = vld [vmem:[#allocation2 + $0x20] sm:$0xff]  ;;  %v231_v15 = vld [vmem:[#allocation2 + $0x30] sm:$0xff]  ;;  %v1430_v16 = vpack.c.bf16 %v232_v10, %v230_v9  ;;  %v234_v19 = vld [vmem:[#allocation2 + $0x48] sm:$0xff]  ;;  %p1706_p4 = por %p1705_p3, %p1704_p2 }
  0x46   : > { %765 = vrot.lane.b32.xlu0 %v1935_v13, %s1802_s6  ;;  %767 = vrot.lane.b32.xlu1 %v1937_v14, %s1802_s6  ;;  %v749_v17 = vld [vmem:[#allocation2 + $0x280] sm:$0xff]  ;;  %v751_v18 = vld [vmem:[#allocation2 + $0x290] sm:$0xff]  ;;  %v236_v21 = vld [vmem:[#allocation2 + $0x58] sm:$0xff]  ;;  %v1432_v25 = vpack.c.bf16 %v231_v15, %v229_v12 }
  0x47   : > { %1425 = vmatpush1.bf16.msra.mxu1 %v1424_v61  ;;  %1487 = vmatprep.subr.bf16.mxu0 %v1486_v62  ;;  %v754_v22 = vld [vmem:[#allocation2 + $0x2a8] sm:$0xff]  ;;  %v756_v23 = vld [vmem:[#allocation2 + $0x2b8] sm:$0xff]  ;;  %v1492_v26 = vpack.c.bf16 %v751_v18, %v749_v17  ;;  %v233_v27 = vld [vmem:[#allocation2 + $0x40] sm:$0xff]  ;;  %v1434_v29 = vpack.c.bf16 %v236_v21, %v234_v19  ;;  %p1707_p7 = pnand %p1706_p4, %p1700_p12 }
  0x48   : > { %1427 = vmatprep.subr.bf16.mxu1 %v1426_v63  ;;  %v235_v28 = vld [vmem:[#allocation2 + $0x50] sm:$0xff]  ;;  %v1494_v30 = vpack.c.bf16 %v756_v23, %v754_v22  ;;  %v753_v31 = vld [vmem:[#allocation2 + $0x2a0] sm:$0xff]  ;;  %v238_v33 = vld [vmem:[#allocation2 + $0x68] sm:$0xff] }
  0x49   : > { %1489 = vmatpush1.bf16.msra.mxu0 %v1488_v5  ;;  %v755_v32 = vld [vmem:[#allocation2 + $0x2b0] sm:$0xff]  ;;  %v240_v35 = vld [vmem:[#allocation2 + $0x78] sm:$0xff]  ;;  %v758_v36 = vld [vmem:[#allocation2 + $0x2c8] sm:$0xff]  ;;  %v1436_v38 = vpack.c.bf16 %v235_v28, %v233_v27 }
  0x4a   : > { %444 = vrot.lane.b32.xlu0 %v1922_v1, %s1802_s6  ;;  %446 = vrot.lane.b32.xlu1 %v1924_v2, %s1802_s6  ;;  %v760_v37 = vld [vmem:[#allocation2 + $0x2d8] sm:$0xff]  ;;  %v1496_v39 = vpack.c.bf16 %v755_v32, %v753_v31  ;;  %v237_v40 = vld [vmem:[#allocation2 + $0x60] sm:$0xff]  ;;  %v239_v41 = vld [vmem:[#allocation2 + $0x70] sm:$0xff]  ;;  %v1438_v43 = vpack.c.bf16 %v240_v35, %v238_v33 }
  0x4b   : > { %1491 = vmatprep.subr.bf16.mxu0 %v1490_v6  ;;  %v1498_v44 = vpack.c.bf16 %v760_v37, %v758_v36  ;;  %v757_v45 = vld [vmem:[#allocation2 + $0x2c0] sm:$0xff]  ;;  %v759_v46 = vld [vmem:[#allocation2 + $0x2d0] sm:$0xff]  ;;  %v429_v47 = vld [vmem:[#allocation2 + $0x108] sm:$0xff]  ;;  %v1440_v51 = vpack.c.bf16 %v239_v41, %v237_v40 }
  0x4c   : > { %v431_v48 = vld [vmem:[#allocation2 + $0x118] sm:$0xff]  ;;  %v762_v49 = vld [vmem:[#allocation2 + $0x2e8] sm:$0xff]  ;;  %v1500_v52 = vpack.c.bf16 %v759_v46, %v757_v45  ;;  %v428_v53 = vld [vmem:[#allocation2 + $0x100] sm:$0xff] }
  0x4d   : > { %v764_v50 = vld [vmem:[#allocation2 + $0x2f8] sm:$0xff]  ;;  %v430_v54 = vld [vmem:[#allocation2 + $0x110] sm:$0xff]  ;;  %v1442_v55 = vpack.c.bf16 %v431_v48, %v429_v47  ;;  %v761_v58 = vld [vmem:[#allocation2 + $0x2e0] sm:$0xff] }
  0x4e   : > { %979 = vrot.lane.b32.xlu0 %v1955_v57, %s1801_s5  ;;  %981 = vrot.lane.b32.xlu1 %v1958_v60, %s1801_s5  ;;  %v1502_v56 = vpack.c.bf16 %v764_v50, %v762_v49  ;;  %v763_v59 = vld [vmem:[#allocation2 + $0x2f0] sm:$0xff]  ;;  %v433_v61 = vld [vmem:[#allocation2 + $0x128] sm:$0xff]  ;;  %v435_v62 = vld [vmem:[#allocation2 + $0x138] sm:$0xff]  ;;  %v1444_v4 = vpack.c.bf16 %v430_v54, %v428_v53 }
  0x4f   : > { %v856_v63 = vld [vmem:[#allocation2 + $0x308] sm:$0xff]  ;;  %v858_v3 = vld [vmem:[#allocation2 + $0x318] sm:$0xff]  ;;  %v1504_v5 = vpack.c.bf16 %v763_v59, %v761_v58  ;;  %v432_v6 = vld [vmem:[#allocation2 + $0x120] sm:$0xff]  ;;  %v1446_v8 = vpack.c.bf16 %v435_v62, %v433_v61 }
  0x50   : > { %v434_v7 = vld [vmem:[#allocation2 + $0x130] sm:$0xff]  ;;  %v1506_v9 = vpack.c.bf16 %v858_v3, %v856_v63  ;;  %v855_v10 = vld [vmem:[#allocation2 + $0x300] sm:$0xff]  ;;  %v437_v12 = vld [vmem:[#allocation2 + $0x148] sm:$0xff] }
  0x51   : > { %v439_v15 = vld [vmem:[#allocation2 + $0x158] sm:$0xff]  ;;  %v1448_v19 = vpack.c.bf16 %v434_v7, %v432_v6  ;;  %v436_v21 = vld [vmem:[#allocation2 + $0x140] sm:$0xff]  ;;  %v438_v22 = vld [vmem:[#allocation2 + $0x150] sm:$0xff] }
  0x52   : > { %1087 = vrot.lane.b32.xlu1 %v1958_v60, %s1802_s6  ;;  %1085 = vrot.lane.b32.xlu0 %v1955_v57, %s1802_s6  ;;  %v862_v17 = vld [vmem:[#allocation2 + $0x338] sm:$0xff]  ;;  %v1450_v23 = vpack.c.bf16 %v439_v15, %v437_v12  ;;  %v441_v27 = vld [vmem:[#allocation2 + $0x168] sm:$0xff]  ;;  %v440_v32 = vld [vmem:[#allocation2 + $0x160] sm:$0xff] }
  0x53   : > { %v443_v28 = vld [vmem:[#allocation2 + $0x178] sm:$0xff]  ;;  %v442_v33 = vld [vmem:[#allocation2 + $0x170] sm:$0xff]  ;;  %v863_v37 = vld [vmem:[#allocation2 + $0x340] sm:$0xff] }
  0x54   : > { %v1454_v35 = vpack.c.bf16 %v443_v28, %v441_v27  ;;  %v537_v40 = vld [vmem:[#allocation2 + $0x198] sm:$0xff]  ;;  %v536_v45 = vld [vmem:[#allocation2 + $0x190] sm:$0xff]  ;;  %v867_v48 = vld [vmem:[#allocation2 + $0x360] sm:$0xff] }
  0x55   : > { %v870_v41 = vld [vmem:[#allocation2 + $0x378] sm:$0xff]  ;;  %v869_v49 = vld [vmem:[#allocation2 + $0x370] sm:$0xff]  ;;  %v539_v50 = vld [vmem:[#allocation2 + $0x1a8] sm:$0xff] }
  0x56   : > { %v966_v53 = vld [vmem:[#allocation2 + $0x398] sm:$0xff]  ;;  %v538_v58 = vld [vmem:[#allocation2 + $0x1a0] sm:$0xff]  ;;  %v540_v59 = vld [vmem:[#allocation2 + $0x1b0] sm:$0xff] }
  0x57   : > { %v963_v63 = vld [vmem:[#allocation2 + $0x380] sm:$0xff]  ;;  %v965_v3 = vld [vmem:[#allocation2 + $0x390] sm:$0xff]  ;;  %v968_v6 = vld [vmem:[#allocation2 + $0x3a8] sm:$0xff] }
  0x58   : > { %v970_v7 = vld [vmem:[#allocation2 + $0x3b8] sm:$0xff] }
  0xb0   : > { %v261_v20 = vpop.permute.xlu0 %260  ;;  %v263_v24 = vpop.permute.xlu1 %262 }
  0xb1   : > { %1382 = vmatmul.mubr.msk.f32.vlgmr.msra.gmra.mrb[0].mxu1 %vm264_vm2, %v261_v20 }
  0xb2   : > { %1429 = vmatpush1.bf16.msra.mxu1 %v1428_v11  ;;  %339 = vmatprep.mubr.f32.mxu1 %v1800_v0  ;;  %v857_v11 = vld [vmem:[#allocation2 + $0x310] sm:$0xff] }
  0xb3   : > { %1431 = vmatprep.subr.bf16.mxu1 %v1430_v16  ;;  %v860_v16 = vld [vmem:[#allocation2 + $0x328] sm:$0xff]  ;;  %v1508_v20 = vpack.c.bf16 %v857_v11, %v855_v10  ;;  %v542_v10 = vld [vmem:[#allocation2 + $0x1c0] sm:$0xff]  ;;  %v544_v11 = vld [vmem:[#allocation2 + $0x1d0] sm:$0xff] }
  0xb4   : > { %v660_v34 = vpop.permute.xlu0 %659  ;;  %v662_v42 = vpop.permute.xlu1 %661 }
  0xb5   : > { %1390 = vmatmul.mubr.msk.f32.vlgmr.msra.gmra.mrb[0].mxu0 %vm264_vm2, %v660_v34  ;;  %1383 = vmatmul.mubr.msk.f32.gmra.mrb[2].mxu1 %vm264_vm2, %v263_v24  ;;  %v1510_v24 = vpack.c.bf16 %v862_v17, %v860_v16  ;;  %v1526_v16 = vpack.c.bf16 %v970_v7, %v968_v6  ;;  %v967_v17 = vld [vmem:[#allocation2 + $0x3a0] sm:$0xff] }
  0xb6   : > { %1433 = vmatpush1.bf16.msra.mxu1 %v1432_v25  ;;  %1493 = vmatpush1.bf16.msra.mxu0 %v1492_v26  ;;  %v859_v25 = vld [vmem:[#allocation2 + $0x320] sm:$0xff]  ;;  %v861_v26 = vld [vmem:[#allocation2 + $0x330] sm:$0xff] }
  0xb7   : > { %1435 = vmatprep.subr.bf16.mxu1 %v1434_v29  ;;  %1495 = vmatprep.subr.bf16.mxu0 %v1494_v30  ;;  %v864_v29 = vld [vmem:[#allocation2 + $0x348] sm:$0xff]  ;;  %v866_v30 = vld [vmem:[#allocation2 + $0x358] sm:$0xff]  ;;  %v1512_v31 = vpack.c.bf16 %v861_v26, %v859_v25  ;;  %v546_v25 = vld [vmem:[#allocation2 + $0x1e0] sm:$0xff] }
  0xb8   : > { %414 = vmatprep.mubr.f32.mxu1 %v1800_v0  ;;  %737 = vmatprep.mubr.f32.mxu0 %v1800_v0  ;;  %v766_v18 = vpop.permute.xlu0 %765  ;;  %v768_v34 = vpop.permute.xlu1 %767  ;;  %v1514_v36 = vpack.c.bf16 %v866_v30, %v864_v29  ;;  %v548_v26 = vld [vmem:[#allocation2 + $0x1f0] sm:$0xff]  ;;  %v971_v29 = vld [vmem:[#allocation2 + $0x3c0] sm:$0xff] }
  0xb9   : > { %1391 = vmatmul.mubr.msk.f32.gmra.mrb[2].mxu0 %vm264_vm2, %v662_v42  ;;  %v1456_v42 = vpack.c.bf16 %v442_v33, %v440_v32  ;;  %v973_v30 = vld [vmem:[#allocation2 + $0x3d0] sm:$0xff]  ;;  %v1072_v32 = vld [vmem:[#allocation2 + $0x418] sm:$0xff]  ;;  %v1472_v33 = vpack.c.bf16 %v548_v26, %v546_v25 }
  0xba   : > { %1437 = vmatpush1.bf16.msra.mxu1 %v1436_v38  ;;  %1497 = vmatpush1.bf16.msra.mxu0 %v1496_v39  ;;  %v865_v38 = vld [vmem:[#allocation2 + $0x350] sm:$0xff]  ;;  %v535_v39 = vld [vmem:[#allocation2 + $0x188] sm:$0xff] }
  0xbb   : > { %1439 = vmatprep.subr.bf16.mxu1 %v1438_v43  ;;  %1499 = vmatprep.subr.bf16.mxu0 %v1498_v44  ;;  %v1516_v43 = vpack.c.bf16 %v865_v38, %v863_v37  ;;  %v534_v44 = vld [vmem:[#allocation2 + $0x180] sm:$0xff]  ;;  %v1458_v46 = vpack.c.bf16 %v537_v40, %v535_v39  ;;  %v977_v38 = vld [vmem:[#allocation2 + $0x3f0] sm:$0xff] }
  0xbc   : > { %837 = vmatprep.mubr.f32.mxu0 %v1800_v0  ;;  %v445_v54 = vpop.permute.xlu0 %444  ;;  %v447_v12 = vpop.permute.xlu1 %446  ;;  %v1069_v39 = vld [vmem:[#allocation2 + $0x400] sm:$0xff]  ;;  %v1071_v40 = vld [vmem:[#allocation2 + $0x410] sm:$0xff] }
  0xbe   : > { %1441 = vmatpush1.bf16.msra.mxu1 %v1440_v51  ;;  %1501 = vmatpush1.bf16.msra.mxu0 %v1500_v52  ;;  %v541_v51 = vld [vmem:[#allocation2 + $0x1b8] sm:$0xff]  ;;  %v964_v52 = vld [vmem:[#allocation2 + $0x388] sm:$0xff] }
  0xbf   : > { %1443 = vmatprep.subr.bf16.mxu1 %v1442_v55  ;;  %1503 = vmatprep.subr.bf16.mxu0 %v1502_v56  ;;  %v1460_v55 = vpack.c.bf16 %v536_v45, %v534_v44  ;;  %v1520_v56 = vpack.c.bf16 %v869_v49, %v867_v48  ;;  %v1462_v61 = vpack.c.bf16 %v541_v51, %v539_v50  ;;  %v1075_v44 = vld [vmem:[#allocation2 + $0x430] sm:$0xff]  ;;  %v1077_v50 = vld [vmem:[#allocation2 + $0x440] sm:$0xff] }
  0xc0   : > { %v1522_v62 = vpack.c.bf16 %v966_v53, %v964_v52  ;;  %v980_v48 = vpop.permute.xlu0 %979  ;;  %v1079_v51 = vld [vmem:[#allocation2 + $0x450] sm:$0xff]  ;;  %v1082_v53 = vld [vmem:[#allocation2 + $0x468] sm:$0xff] }
  0xc1   : > { %1384 = vmatmul.mubr.msk.f32.vlgmr.msra.gmra.mrb[0].mxu1 %vm264_vm2, %v1922_v1  ;;  %v1452_v1 = vpack.c.bf16 %v438_v22, %v436_v21  ;;  %v972_v21 = vld [vmem:[#allocation2 + $0x3c8] sm:$0xff]  ;;  %v974_v22 = vld [vmem:[#allocation2 + $0x3d8] sm:$0xff] }
  0xc2   : > { %1445 = vmatpush1.bf16.msra.mxu1 %v1444_v4  ;;  %1505 = vmatpush1.bf16.msra.mxu0 %v1504_v5  ;;  %v543_v4 = vld [vmem:[#allocation2 + $0x1c8] sm:$0xff]  ;;  %v545_v5 = vld [vmem:[#allocation2 + $0x1d8] sm:$0xff]  ;;  %v1530_v28 = vpack.c.bf16 %v974_v22, %v972_v21 }
  0xc3   : > { %1447 = vmatprep.subr.bf16.mxu1 %v1446_v8  ;;  %1507 = vmatprep.subr.bf16.mxu0 %v1506_v9  ;;  %v1464_v8 = vpack.c.bf16 %v540_v59, %v538_v58  ;;  %v1524_v9 = vpack.c.bf16 %v965_v3, %v963_v63  ;;  %v1466_v15 = vpack.c.bf16 %v545_v5, %v543_v4  ;;  %v1081_v58 = vld [vmem:[#allocation2 + $0x460] sm:$0xff]  ;;  %v1083_v59 = vld [vmem:[#allocation2 + $0x470] sm:$0xff]  ;;  %v1176_v5 = vlaneseq }
  0xc4   : > { %420 = vmatprep.mubr.f32.mxu1 %v1800_v0 }
  0xc5   : > { %1392 = vmatmul.mubr.msk.f32.vlgmr.msra.gmra.mrb[0].mxu0 %vm264_vm2, %v766_v18  ;;  %1385 = vmatmul.mubr.msk.f32.gmra.mrb[2].mxu1 %vm264_vm2, %v1924_v2  ;;  %v868_v2 = vld [vmem:[#allocation2 + $0x368] sm:$0xff]  ;;  %v969_v18 = vld [vmem:[#allocation2 + $0x3b0] sm:$0xff] }
  0xc6   : > { %1449 = vmatpush1.bf16.msra.mxu1 %v1448_v19  ;;  %1509 = vmatpush1.bf16.msra.mxu0 %v1508_v20  ;;  %v1518_v47 = vpack.c.bf16 %v870_v41, %v868_v2  ;;  %v547_v19 = vld [vmem:[#allocation2 + $0x1e8] sm:$0xff]  ;;  %v549_v20 = vld [vmem:[#allocation2 + $0x1f8] sm:$0xff] }
  0xc7   : > { %1451 = vmatprep.subr.bf16.mxu1 %v1450_v23  ;;  %1511 = vmatprep.subr.bf16.mxu0 %v1510_v24  ;;  %v1468_v23 = vpack.c.bf16 %v544_v11, %v542_v10  ;;  %v1528_v24 = vpack.c.bf16 %v969_v18, %v967_v17  ;;  %v1470_v27 = vpack.c.bf16 %v549_v20, %v547_v19  ;;  %v1074_v2 = vld [vmem:[#allocation2 + $0x428] sm:$0xff]  ;;  %v1076_v41 = vld [vmem:[#allocation2 + $0x438] sm:$0xff] }
  0xc8   : > { %516 = vmatprep.mubr.f32.mxu1 %v1800_v0  ;;  %843 = vmatprep.mubr.f32.mxu0 %v1800_v0  ;;  %v1542_v45 = vpack.c.bf16 %v1076_v41, %v1074_v2 }
  0xc9   : > { %1393 = vmatmul.mubr.msk.f32.gmra.mrb[2].mxu0 %vm264_vm2, %v768_v34  ;;  %v1532_v34 = vpack.c.bf16 %v973_v30, %v971_v29 }
  0xca   : > { %1453 = vmatpush1.bf16.msra.mxu1 %v1452_v1  ;;  %1513 = vmatpush1.bf16.msra.mxu0 %v1512_v31  ;;  %v976_v1 = vld [vmem:[#allocation2 + $0x3e8] sm:$0xff] }
  0xcb   : > { %1455 = vmatprep.subr.bf16.mxu1 %v1454_v35  ;;  %1515 = vmatprep.subr.bf16.mxu0 %v1514_v36  ;;  %v1070_v31 = vld [vmem:[#allocation2 + $0x408] sm:$0xff]  ;;  %v975_v35 = vld [vmem:[#allocation2 + $0x3e0] sm:$0xff] }
  0xcc   : > { %945 = vmatprep.mubr.f32.mxu0 %v1800_v0  ;;  %v1538_v37 = vpack.c.bf16 %v1072_v32, %v1070_v31 }
  0xce   : > { %1457 = vmatpush1.bf16.msra.mxu1 %v1456_v42  ;;  %1517 = vmatpush1.bf16.msra.mxu0 %v1516_v43  ;;  %v1536_v42 = vpack.c.bf16 %v977_v38, %v975_v35  ;;  %v1073_v43 = vld [vmem:[#allocation2 + $0x420] sm:$0xff] }
  0xcf   : > { %1459 = vmatprep.subr.bf16.mxu1 %v1458_v46  ;;  %1519 = vmatprep.subr.bf16.mxu0 %v1518_v47  ;;  %v1078_v46 = vld [vmem:[#allocation2 + $0x448] sm:$0xff]  ;;  %v1080_v47 = vld [vmem:[#allocation2 + $0x458] sm:$0xff]  ;;  %v1544_v49 = vpack.c.bf16 %v1075_v44, %v1073_v43 }
  0xd0   : > { %v1546_v52 = vpack.c.bf16 %v1080_v47, %v1078_v46 }
  0xd1   : > { %1386 = vmatmul.mubr.msk.f32.vlgmr.msra.gmra.mrb[0].mxu1 %vm264_vm2, %v445_v54  ;;  %v1084_v54 = vld [vmem:[#allocation2 + $0x478] sm:$0xff] }
  0xd2   : > { %1461 = vmatpush1.bf16.msra.mxu1 %v1460_v55  ;;  %1521 = vmatpush1.bf16.msra.mxu0 %v1520_v56  ;;  %v1548_v55 = vpack.c.bf16 %v1079_v51, %v1077_v50  ;;  %v1550_v56 = vpack.c.bf16 %v1084_v54, %v1082_v53 }
  0xd3   : > { %1463 = vmatprep.subr.bf16.mxu1 %v1462_v61  ;;  %1523 = vmatprep.subr.bf16.mxu0 %v1522_v62  ;;  %v1086_v62 = vpop.permute.xlu0 %1085 }
  0xd4   : > { %522 = vmatprep.mubr.f32.mxu1 %v1800_v0 }
  0xd5   : > { %1394 = vmatmul.mubr.msk.f32.vlgmr.msra.gmra.mrb[0].mxu0 %vm264_vm2, %v1955_v57  ;;  %1387 = vmatmul.mubr.msk.f32.gmra.mrb[2].mxu1 %vm264_vm2, %v447_v12  ;;  %v978_v57 = vld [vmem:[#allocation2 + $0x3f8] sm:$0xff] }
  0xd6   : > { %1465 = vmatpush1.bf16.msra.mxu1 %v1464_v8  ;;  %1525 = vmatpush1.bf16.msra.mxu0 %v1524_v9  ;;  %v1534_v36 = vpack.c.bf16 %v978_v57, %v976_v1  ;;  %v1177_v8 = vshrl.u32 %v1176_v5, 7 }
  0xd7   : > { %1467 = vmatprep.subr.bf16.mxu1 %v1466_v15  ;;  %1527 = vmatprep.subr.bf16.mxu0 %v1526_v16  ;;  %v1174_v15 = vld [vmem:[%s2097_s2] sm:$0x3] }
  0xd8   : > { %625 = vmatprep.mubr.f32.mxu1 %v1800_v0  ;;  %951 = vmatprep.mubr.f32.mxu0 %v1800_v0  ;;  %v1178_v11 = vsub.s32 0, %v1177_v8  ;;  %v1182_v12 = vsub.s32 1, %v1177_v8 }
  0xd9   : > { %1395 = vmatmul.mubr.msk.f32.gmra.mrb[2].mxu0 %vm264_vm2, %v1958_v60  ;;  %v1540_v60 = vpack.c.bf16 %v1071_v40, %v1069_v39 }
  0xda   : > { %1469 = vmatpush1.bf16.msra.mxu1 %v1468_v23  ;;  %1529 = vmatpush1.bf16.msra.mxu0 %v1528_v24  ;;  %v1179_v17 = vrot.slane %v1174_v15, %v1178_v11  ;;  %v1183_v18 = vrot.slane %v1174_v15, %v1182_v12 }
  0xdb   : > { %1471 = vmatprep.subr.bf16.mxu1 %v1470_v27  ;;  %1531 = vmatprep.subr.bf16.mxu0 %v1530_v28 }
  0xdc   : > { %1051 = vmatprep.mubr.f32.mxu0 %v1800_v0 }
  0xde   : > { %1473 = vmatpush1.bf16.msra.mxu1 %v1472_v33  ;;  %1533 = vmatpush1.bf16.msra.mxu0 %v1532_v34 }
  0xdf   : > { %1535 = vmatprep.subr.bf16.mxu0 %v1534_v36  ;;  %1554 = vmatprep.subr.bf16.mxu1 %v1538_v37 }
  0xe1   : > { %1388 = vmatmul.mubr.msk.f32.vlgmr.msra.gmra.mrb[0].mxu1 %vm264_vm2, %v1935_v13  ;;  %v982_v13 = vpop.permute.xlu1 %981 }
  0xe2   : > { %1537 = vmatpush1.bf16.msra.mxu0 %v1536_v42  ;;  %1558 = vmatpush1.bf16.msra.mxu1 %v1540_v60 }
  0xe3   : > { %631 = vmatprep.mubr.f32.mxu1 %v1800_v0  ;;  %1539 = vmatprep.subr.bf16.mxu0 %v1538_v37 }
  0xe4   : > { %1555 = vmatprep.subr.bf16.mxu1 %v1542_v45 }
  0xe5   : > { %1389 = vmatmul.mubr.msk.f32.gmra.mrb[2].mxu1 %vm264_vm2, %v1937_v14  ;;  %1396 = vmatmul.mubr.msk.f32.vlgmr.msra.gmra.mrb[0].mxu0 %vm264_vm2, %v980_v48  ;;  %v1552_v14 = vpack.c.bf16 %v1083_v59, %v1081_v58  ;;  %v1088_v61 = vpop.permute.xlu1 %1087 }
  0xe6   : > { %1541 = vmatpush1.bf16.msra.mxu0 %v1540_v60  ;;  %1559 = vmatpush1.bf16.msra.mxu1 %v1544_v49 }
  0xe7   : > { %1057 = vmatprep.mubr.f32.mxu0 %v1800_v0  ;;  %1543 = vmatprep.subr.bf16.mxu0 %v1542_v45 }
  0xe8   : > { %1556 = vmatprep.subr.bf16.mxu1 %v1546_v52  ;;  %1163 = vmatprep.mubr.f32.mxu1 %v1800_v0 }
  0xe9   : > { %1397 = vmatmul.mubr.msk.f32.gmra.mrb[2].mxu0 %vm264_vm2, %v982_v13 }
  0xea   : > { %1545 = vmatpush1.bf16.msra.mxu0 %v1544_v49  ;;  %1560 = vmatpush1.bf16.msra.mxu1 %v1548_v55 }
  0xeb   : > { %1547 = vmatprep.subr.bf16.mxu0 %v1546_v52  ;;  %1557 = vmatprep.subr.bf16.mxu1 %v1550_v56 }
  0xec   : > { %1157 = vmatprep.mubr.f32.mxu0 %v1800_v0 }
  0xee   : > { %1549 = vmatpush1.bf16.msra.mxu0 %v1548_v55  ;;  %1561 = vmatpush1.bf16.msra.mxu1 %v1552_v14 }
  0xef   : > { %1551 = vmatprep.subr.bf16.mxu0 %v1550_v56 }
  0xf1   : > { %1399 = vmatmul.mubr.msk.f32.vlgmr.msra.gmra.mrb[4].mxu1 %vm264_vm2, %v1088_v61 }
  0xf2   : > { %1553 = vmatpush1.bf16.msra.mxu0 %v1552_v14 }
  0xf5   : > { %1398 = vmatmul.mubr.msk.f32.vlgmr.msra.gmra.mrb[0].mxu0 %vm264_vm2, %v1086_v62 }
 0x1b4   : > { %v627_v63 = vpop.f32.mrb[0].mxu1 }
 0x1b5   : > { %v629_v3 = vpop.f32.mrb[1].mxu1 }
 0x1b8   : > { %v633_v4 = vpop.f32.mrb[2].mxu1 }
 0x1b9   : > { %v635_v6 = vpop.f32.mrb[3].mxu1 }
 0x1bc   : > { %v1059_v7 = vpop.f32.mrb[2].mxu0 }
 0x1bd   : > { %v1564_v9 = vadd.f32 %v1059_v7, %v633_v4  ;;  %v1061_v10 = vpop.f32.mrb[3].mxu0 }
 0x1be   : > { %v1566_v0 = vadd.f32 %v1061_v10, %v635_v6 }
 0x1c4   : > { %v1165_v16 = vpop.f32.mrb[4].mxu1 }
 0x1c5   : > { %v1565_v19 = vadd.f32 %v1564_v9, %v1165_v16  ;;  %v1167_v20 = vpop.f32.mrb[5].mxu1 }
 0x1c6   : > { %v1567_v21 = vadd.f32 %v1566_v0, %v1167_v20 }
 0x1c7   : > { %v1188_v22 = vadd.f32 %v1565_v19, %v1179_v17 }
 0x1c8   : > { %v1189_v23 = vadd.f32 %v1567_v21, %v1183_v18  ;;  %v1159_v24 = vpop.f32.mrb[0].mxu0 }
 0x1c9   : > { %v1562_v25 = vadd.f32 %v1159_v24, %v627_v63  ;;  %v1161_v26 = vpop.f32.mrb[1].mxu0  ;;  %v1193_v29 = vmin.f32 %v1188_v22, 0.0  ;;  %vm1191_vm3 = vcmp.gt.f32.partialorder %v1188_v22, 0.0 }
 0x1ca   : > { %v1203_v27 = vsub.f32 0.0, %v1189_v23  ;;  %v1563_v28 = vadd.f32 %v1161_v26, %v629_v3 }
 0x1cb   : > { %v1186_v1 = vadd.f32 %v1562_v25, %v1179_v17  ;;  %v1196_v32 = vmul.f32 1.442695, %v1193_v29 }
 0x1cc   : > { %v1206_v30 = vmul.f32 1.442695, %v1203_v27  ;;  %v1187_v57 = vadd.f32 %v1563_v28, %v1183_v18 }
 0x1cd   : > { %v1192_v33 = vmin.f32 %v1186_v1, 0.0  ;;  %vm1190_vm4 = vcmp.gt.f32.partialorder %v1186_v1, 0.0 }
 0x1ce   : > { %1657 = vpow2.f32 %v1206_v30  ;;  %v1202_v31 = vsub.f32 0.0, %v1187_v57 }
 0x1cf   : > { %v1194_v35 = vmul.f32 1.442695, %v1192_v33 }
 0x1d0   : > { %v1204_v34 = vmul.f32 1.442695, %v1202_v31 }
 0x1d2   : > { %1659 = vpow2.f32 %v1204_v34 }
 0x1d3   : > { %1661 = vpow2.f32 %v1196_v32 }
 0x1d4   : > { %1663 = vpow2.f32 %v1194_v35 }
 0x1d8   : > { %v1658_v36 = vpop.eup %1657 }
 0x1d9   : > { %v1209_v37 = vadd.f32 1.0, %v1658_v36 }
 0x1db   : > { %1665 = vrcp.f32 %v1209_v37 }
 0x1dc   : > { %v1660_v38 = vpop.eup %1659 }
 0x1dd   : > { %v1208_v39 = vadd.f32 1.0, %v1660_v38  ;;  %v1662_v40 = vpop.eup %1661 }
 0x1de   : > { %v1401_v2 = vadd.f32 -1.0, %v1662_v40  ;;  %v1664_v41 = vpop.eup %1663 }
 0x1df   : > { %1667 = vrcp.f32 %v1208_v39  ;;  %v1400_v43 = vadd.f32 -1.0, %v1664_v41 }
 0x1e0   : > { %v1201_v60 = vsel %vm1191_vm3, %v1188_v22, %v1401_v2 }
 0x1e1   : > { %v1200_v46 = vsel %vm1190_vm4, %v1186_v1, %v1400_v43 }
 0x1e5   : > { %v1666_v42 = vpop.eup %1665 }
 0x1e6   : > { %v1213_v44 = vmul.f32 %v1666_v42, %v1201_v60 }
 0x1e8   : > { %1215 = vst [vmem:[%s209_s12 + $0x8] sm:$0xff] %v1213_v44  ;;  %v1224_v50 = vmul.f32 %v1213_v44, %v1213_v44 }
 0x1e9   : > { %v1668_v45 = vpop.eup %1667 }
 0x1ea   : > { %v1212_v47 = vmul.f32 %v1668_v45, %v1200_v46 }
 0x1ec   : > { %1214 = vst [vmem:[%s209_s12] sm:$0xff] %v1212_v47  ;;  %v1216_v48 = vadd.f32 %v1213_v44, %v1212_v47  ;;  %v1223_v49 = vmul.f32 %v1212_v47, %v1212_v47 }
 0x1ed   : > { %1710 = shalt.err (!%p1707_p7)
}
 0x1ee   : > { %s1711_s5 = scalar_lea.hbm %s2019_s22, 256  ;;  %s1715_s8 = scalar_lea.hbm %s2098_s3, 512 }
 0x1ef   : > { %p1712_p8 = scmp.ne.s32.totalorder %s2019_s22, %s1711_s5  ;;  %p1716_p1 = scmp.lt.u32.totalorder %s2019_s22, %s2098_s3 }
 0x1f0   : > { %p1717_p0 = scmp.lt.u32.totalorder %s1715_s8, %s1711_s5  ;;  %p1719_p6 = scmp.lt.u32.totalorder %s1711_s5, %s2019_s22 }
 0x1f1   : > { %p1713_p11 = pnand %p1712_p8, %p2110_p9 }
 0x1f2   : > { %p1718_p5 = por %p1717_p0, %p1716_p1 }
 0x1f3   : > { %p1714_p13 = pneg %p1713_p11 }
 0x1f4   : > { %p1720_p10 = por %p1719_p6, %p1718_p5 }
 0x1f6   : > { %p1721_p12 = pnand %p1720_p10, %p1714_p13 }
 0x1f8   : > { %1724 = shalt.err (!%p1721_p12)
}
 0x1f9   : > { %s1804_s12 = smov 128   ;;  %s1805_s14 = smov 8   ;;  %v1217_v51 = vrot.slane %v1216_v48, 4  ;;  %v1225_v52 = vadd.f32 %v1224_v50, %v1223_v49  ;;  %vm1232_vm5 = vcmask 1040384  }
 0x1fa   : > { %1599 = dma.vmem_to_hbm [thread:$0]  (%p2110_p9), %s2021_s13, 256, %s2019_s22, %s1236_s23, %s1804_s12, %s1804_s12, %s1805_s14  }
 0x1fb   : > { %v1218_v53 = vadd.f32 %v1217_v51, %v1216_v48  ;;  %v1226_v54 = vrot.slane %v1225_v52, 4  ;;  %s1380_s20 = sshll.u32 %s2012_s9, 1  ;;  %s1406_s28 = sshll.u32 %s1853_s19, 5 }
 0x1fc   : > { %s216_s29 = scalar_lea.vmem [#allocation6], %s1380_s20  ;;  %s2052_s23 = scalar_lea.hbm %s2099_s4, %s1406_s28 }
 0x1fd   : > { %v1219_v13 = vrot.slane %v1218_v53, 2  ;;  %v1227_v55 = vadd.f32 %v1226_v54, %v1225_v52  ;;  %s1270_s30 = sshll.u32 %s216_s29, 4  ;;  %s1241_s27 = scalar_lea.sflag [#allocation7], %s2012_s9  ;;  %s2054_s30 = int_to_ptr.vmem [resolvable:$true] %s1270_s30 }
 0x1fe   : > { %s1725_s5 = scalar_lea.vmem %s2054_s30, 32  ;;  %s1806_s19 = smov [#allocation6]  }
 0x1ff   : > { %v1220_v56 = vadd.f32 %v1219_v13, %v1218_v53  ;;  %v1228_v58 = vrot.slane %v1227_v55, 2  ;;  %p1726_p2 = scmp.ne.s32.totalorder %s2054_s30, %s1725_s5  ;;  %s1729_s6 = sshll.u32 %s1806_s19, 4  ;;  %s1730_s6 = int_to_ptr.vmem [resolvable:$false] %s1729_s6 }
 0x200   : > { %s1731_s7 = scalar_lea.vmem %s1730_s6, 64  ;;  %p1732_p7 = scmp.lt.s32.totalorder %s2054_s30, %s1730_s6 }
 0x201   : > { %v1221_v59 = vrot.slane %v1220_v56, 1  ;;  %v1229_v14 = vadd.f32 %v1228_v58, %v1227_v55  ;;  %p1727_p3 = pnand %p1726_p2, %p2110_p9  ;;  %p1733_p8 = scmp.lt.s32.totalorder %s1731_s7, %s1725_s5 }
 0x203   : > { %v1230_v61 = vrot.slane %v1229_v14, 1  ;;  %v1222_v62 = vadd.f32 %v1221_v59, %v1220_v56  ;;  %p1728_p4 = pneg %p1727_p3  ;;  %p1734_p11 = por %p1733_p8, %p1732_p7 }
 0x205   : > { %v1231_v63 = vadd.f32 %v1230_v61, %v1229_v14  ;;  %p1735_p13 = pnand %p1734_p11, %p1728_p4 }
 0x207   : > { %v1233_v3 = vsel %vm1232_vm5, %v1222_v62, %v1231_v63 }
 0x208   : > { %1234 = vst [vmem:[%s216_s29] sm:$0x3] %v1233_v3 }
 0x209   : > { %1738 = shalt.err (!%p1735_p13)
}
 0x20a   : > { %s1739_s9 = scalar_lea.hbm %s2052_s23, 32  ;;  %s1743_s11 = scalar_lea.hbm %s2099_s4, 64 }
 0x20b   : > { %p1740_p1 = scmp.ne.s32.totalorder %s2052_s23, %s1739_s9  ;;  %p1744_p6 = scmp.lt.u32.totalorder %s2052_s23, %s2099_s4 }
 0x20c   : > { %p1745_p10 = scmp.lt.u32.totalorder %s1743_s11, %s1739_s9  ;;  %p1747_p2 = scmp.lt.u32.totalorder %s1739_s9, %s2052_s23 }
 0x20d   : > { %p1741_p0 = pnand %p1740_p1, %p2110_p9 }
 0x20e   : > { %p1746_p12 = por %p1745_p10, %p1744_p6 }
 0x20f   : > { %p1742_p5 = pneg %p1741_p0 }
 0x210   : > { %p1748_p3 = por %p1747_p2, %p1746_p12 }
 0x212   : > { %p1749_p4 = pnand %p1748_p3, %p1742_p5 }
 0x214   : > { %1752 = shalt.err (!%p1749_p4)
}
 0x215   : > { %1600 = dma.vmem_to_hbm [thread:$0]  (%p2110_p9), %s2054_s30, 32, %s2052_s23, %s1241_s27  }
 0x216 PF: > { %p1616_p7 = scmp.ge.s32.totalorder %s1795_s18, 2  ;;  %s1282_s20 = sand.u32 1, %s1783_s15  }
 0x217   : > { %p2111_p8 = scmp.ne.s32.totalorder %s2104_s26, 0  ;;  %s1283_s28 = scalar_lea.sflag [#allocation4], %s1282_s20 }
 0x219   : > { %p1608_p11 = pnand %p1616_p7, %p2111_p8 }
 0x21b   : > { %1774 = dma.done.wait (!%p1608_p11), %s1283_s28, 256  }
 0x21c   : > { %1776 = vsyncadd (!%p1608_p11), %s1283_s28, 4294967040  ;;  %s1292_s29 = scalar_lea.sflag [#allocation7], %s1282_s20 }
 0x21d   : > { %1778 = dma.done.wait (!%p1608_p11), %s1292_s29, 32  }
 0x21e   : > { %1780 = vsyncadd (!%p1608_p11), %s1292_s29, 4294967264  ;;  %p19_p9 = scmp.ge.s32.totalorder %s1857_s21, 4   ;;  %s2112_s15 = smov %s1787_s16 }
 0x21f   : > { %s2113_s16 = smov %s1791_s17  ;;  %s2114_s17 = smov %s1868_s24 }
 0x220   : > { %s2115_s18 = smov %s1857_s21  ;;  %21 = sbr.rel (!%p19_p9) target bundleno = 6 (0x6), region = 97 }
 0x227   :  { %1297 = vsyncpa [#allocation3], 1 }
 0x228   :  { %1299 = vsyncpa [#allocation3 + $0x1], 1 }
 0x229   :  { %1300 = vsyncpa [#allocation4], 1 }
 0x22a   :  { %1302 = vsyncpa [#allocation4 + $0x1], 1 }
 0x22b   :  { %1303 = vsyncpa [#allocation7], 1 }
 0x22c   :  { %1305 = vsyncpa [#allocation7 + $0x1], 1 }

</bundles_post_ra>
